<compile_context>
chip_gen: v6e
topology: v6e:2x2x1
jax: 0.10.0
libtpu: 0.0.40
codegen_flags: <defaults>
</compile_context>

<pallas_src>
import numpy as np
import jax
import jax.numpy as jnp
from jax.experimental import pallas as pl
from jax.experimental.pallas import tpu as pltpu

STATE_DIM = 11   # Gym Reacher-v2 observation dim  (repr_size_in)
ACTION_DIM = 2   # Reacher action dim              (repr_size_out)

_SUBLANE = 8
_MAX_BLOCK_B = 512   # large-batch tile (256 KiB f32 output tile, fits all gens)


# ----------------------------------------------------------------------------
# Group representations (Z2 reflection about the x-axis for Reacher).
# TODO(synk): the original symmetrizer repo hard-codes these matrices; the
# standard reflection representation is used here since the checkpointed
# constants are not available in-script.
# ----------------------------------------------------------------------------
def get_reacher_state_group_representations():
    # obs = [cos q0, cos q1, sin q0, sin q1, tgt_x, tgt_y, qd0, qd1, dx, dy, dz]
    signs = np.array([1, 1, -1, -1, 1, -1, -1, -1, 1, -1, 1], dtype=np.float32)
    return [np.eye(STATE_DIM, dtype=np.float32), np.diag(signs)]


def get_reacher_action_group_representations():
    return [np.eye(ACTION_DIM, dtype=np.float32),
            -np.eye(ACTION_DIM, dtype=np.float32)]


def compute_equivariant_basis(in_group, out_group, n_samples=64, seed=0):
    """Symmetrize random matrices over the group and extract an orthonormal
    basis of the equivariant weight space via SVD (NumPy glue, runs once at
    __init__ time; same recipe as symmetrizer's get_basis)."""
    rng = np.random.RandomState(seed)
    r_out, r_in = out_group[0].shape[0], in_group[0].shape[0]
    M = rng.normal(size=(n_samples, r_out, r_in)).astype(np.float64)
    W_sym = np.zeros_like(M)
    for rho_in, rho_out in zip(in_group, out_group):
        # rho_out^{-1} @ M @ rho_in   (orthogonal reps -> inverse == transpose)
        W_sym += np.einsum("po,noi,iq->npq", rho_out.T, M, rho_in)
    W_sym /= float(len(in_group))
    flat = W_sym.reshape(n_samples, r_out * r_in)
    _, s, vt = np.linalg.svd(flat, full_matrices=False)
    rank = int(np.sum(s > 1e-6 * s[0]))
    basis = vt[:rank].reshape(rank, r_out, r_in)
    return jnp.asarray(basis, dtype=jnp.float32)


# ----------------------------------------------------------------------------
# Pallas kernel: out = x @ W   with lane-dense W of shape (A, N).
# ----------------------------------------------------------------------------
def _basis_linear_kernel(x_ref, w_ref, o_ref):
    # x: (TB, A) ; w: (A, N) lane-dense ; out: (TB, N) -- single MXU pass.
    o_ref[...] = jnp.dot(x_ref[...], w_ref[...],
                         preferred_element_type=jnp.float32)


def single_basis_reacher_forward(state, w_t, channels_out, repr_out,
                                 *, max_block_b=_MAX_BLOCK_B):
    """state: (B, A) or (A,);  w_t: (A, channels_out*repr_out) pre-transposed
    realized equivariant weight.  Returns (B, channels_out, repr_out)."""
    # torch: if state.ndim < 2: state = state.reshape(-1, state.shape[0])
    if state.ndim < 2:
        state = state.reshape(-1, state.shape[0])
    state = state.astype(jnp.float32)
    B, A = state.shape
    A_w, N = w_t.shape
    assert A == A_w, "state dim must equal channels_in * repr_size_in (c_in=1)"
    assert N == channels_out * repr_out

    # Batch padding so the sublane (second-to-last) tile dim is a multiple of 8
    # and large batches tile cleanly.  Zero rows -> zero outputs, sliced off.
    if B <= max_block_b:
        B_pad = ((B + _SUBLANE - 1) // _SUBLANE) * _SUBLANE
        block_b = B_pad                       # single grid step
    else:
        block_b = max_block_b
        B_pad = int(pl.cdiv(B, block_b)) * block_b
    if B_pad != B:
        state = jnp.pad(state, ((0, B_pad - B), (0, 0)))
    grid = (B_pad // block_b,)

    cost = pl.CostEstimate(
        flops=2 * B_pad * A * N,
        transcendentals=0,
        bytes_accessed=4 * (B_pad * A + A * N + B_pad * N))

    out_flat = pl.pallas_call(
        _basis_linear_kernel,
        out_shape=jax.ShapeDtypeStruct((B_pad, N), jnp.float32),
        grid_spec=pltpu.PrefetchScalarGridSpec(
            num_scalar_prefetch=0,
            grid=grid,
            in_specs=[
                pl.BlockSpec((block_b, A), lambda i: (i, 0)),   # state tile
                pl.BlockSpec((A, N), lambda i: (0, 0)),         # full weight
            ],
            out_specs=pl.BlockSpec((block_b, N), lambda i: (i, 0)),
        ),
        compiler_params=pltpu.CompilerParams(
            dimension_semantics=("parallel",)),
        cost_estimate=cost,
    )(state, w_t)

    if B_pad != B:
        out_flat = out_flat[:B]
    # (B, c_out*repr_out) -> (B, c_out, repr_out)  == torch (b, channels_out, 2)
    return out_flat.reshape(B, channels_out, repr_out)


# ----------------------------------------------------------------------------
# Module-equivalent wrapper with deterministic parameter initialization.
# ----------------------------------------------------------------------------
class SingleBasisReacherLayer:
    def __init__(self, input_size, output_size, basis="equivariant",
                 gain_type="xavier", key=None):
        assert basis == "equivariant"
        assert input_size == 1, "reacher state is a single group-repr channel"
        if key is None:
            key = jax.random.PRNGKey(0)
        in_group = get_reacher_state_group_representations()
        out_group = get_reacher_action_group_representations()
        self.repr_size_in = in_group[0].shape[0]
        self.repr_size_out = out_group[0].shape[0]
        self.channels_in = input_size
        self.channels_out = output_size

        # Equivariant basis: (rank, repr_size_out, channels_in * repr_size_in)
        self.basis = compute_equivariant_basis(in_group, out_group)
        self.rank = self.basis.shape[0]

        # xavier gain over the realized weight's fan-in/out, uniform init.
        fan_in = self.channels_in * self.repr_size_in
        fan_out = self.channels_out * self.repr_size_out
        gain = float(np.sqrt(2.0 / (fan_in + fan_out)))
        bound = gain * float(np.sqrt(3.0))
        self.coeffs = jax.random.uniform(
            key, (self.channels_out, self.rank),
            minval=-bound, maxval=bound, dtype=jnp.float32)

        # bias_init=False -> zero bias; dropped from the kernel hot path.
        self.bias = jnp.zeros((self.channels_out, self.repr_size_out),
                              jnp.float32)

        # Realize + pre-transpose the equivariant weight ONCE (batch-
        # independent glue hoisted out of the per-call path).
        # W: (c_out, repr_out, A) -> W_t: (A, c_out*repr_out) lane-dense.
        W = jnp.einsum("zr,roa->zoa", self.coeffs, self.basis)
        self.w_t = W.reshape(self.channels_out * self.repr_size_out,
                             fan_in).T.copy()

    def __call__(self, state):
        return single_basis_reacher_forward(
            state, self.w_t, self.channels_out, self.repr_size_out)


if __name__ == "__main__":
    key = jax.random.PRNGKey(0)
    k_param, k_x1, k_x2 = jax.random.split(key, 3)

    input_size, output_size = 1, 64       # 64 output channels x 2 action dims
    layer = SingleBasisReacherLayer(input_size, output_size, key=k_param)

    # Plain-JAX reference of the exact forward semantics.
    W_ref = jnp.einsum("zr,roa->zoa", layer.coeffs, layer.basis)

    def ref_fwd(s):
        if s.ndim < 2:
            s = s.reshape(-1, s.shape[0])
        return jnp.einsum("ba,zoa->bzo", s, W_ref) + layer.bias[None]

    # Case 1: batch of 16 (single grid step, no padding).
    state16 = jax.random.normal(k_x1, (16, STATE_DIM), dtype=jnp.float32)
    out16 = jax.block_until_ready(layer(state16))
    assert out16.shape == (16, output_size, ACTION_DIM), out16.shape
    assert out16.dtype == jnp.float32
    assert bool(jnp.allclose(out16, ref_fwd(state16), atol=1e-5, rtol=1e-5))

    # Case 2: batch of 5 (exercises the padded-batch path, non-multiple of 8).
    state5 = jax.random.normal(k_x2, (5, STATE_DIM), dtype=jnp.float32)
    out5 = jax.block_until_ready(layer(state5))
    assert out5.shape == (5, output_size, ACTION_DIM), out5.shape
    assert bool(jnp.allclose(out5, ref_fwd(state5), atol=1e-5, rtol=1e-5))

    print("KERNEL_OK")
</pallas_src>

<mosaic_0001>
module attributes {stable_mosaic.version = 11 : i64} {
  func.func @_basis_linear_kernel(%arg0: i32, %arg1: memref<16x11xf32, #tpu.memory_space<vmem>>, %arg2: memref<11x128xf32, #tpu.memory_space<vmem>>, %arg3: memref<16x128xf32, #tpu.memory_space<vmem>>) attributes {dimension_semantics = [#tpu.dimension_semantics<parallel>], iteration_bounds = array<i64: 1>, scalar_prefetch = 0 : i64, scratch_operands = 0 : i64, tpu.core_type = #tpu.core_type<tc>, window_params = [{transform_indices = @transform_0, window_bounds = array<i64: 16, 11>}, {pipeline_mode = #tpu.pipeline_mode<synchronous>, transform_indices = @transform_1, window_bounds = array<i64: 11, 128>}, {transform_indices = @transform_2, window_bounds = array<i64: 16, 128>}]} {
    %c0 = arith.constant 0 : index
    %c0_0 = arith.constant 0 : index
    %0 = vector.load %arg1[%c0, %c0_0] : memref<16x11xf32, #tpu.memory_space<vmem>>, vector<16x11xf32>
    %c0_1 = arith.constant 0 : index
    %c0_2 = arith.constant 0 : index
    %1 = vector.load %arg2[%c0_1, %c0_2] : memref<11x128xf32, #tpu.memory_space<vmem>>, vector<11x128xf32>
    %cst = arith.constant dense<0.000000e+00> : vector<16x128xf32>
    %2 = tpu.matmul %0, %1, %cst {dimension_numbers = #tpu.dot_dimension_numbers<[1], [0], [0], [1], [0, 0, 1, 1], [], []>} : vector<16x11xf32>, vector<11x128xf32>, vector<16x128xf32> -> vector<16x128xf32>
    %c0_3 = arith.constant 0 : index
    %c0_4 = arith.constant 0 : index
    %3 = vector.load %arg3[%c0_3, %c0_4] : memref<16x128xf32, #tpu.memory_space<vmem>>, vector<16x128xf32>
    tpu.vector_store %arg3[%c0_3, %c0_4], %2 {strides = array<i32>} : memref<16x128xf32, #tpu.memory_space<vmem>>, vector<16x128xf32>,
    return
  }
  func.func @transform_0(%arg0: i32) -> (i32, i32) {
    %c0_i32 = arith.constant 0 : i32
    %c0_i32_0 = arith.constant 0 : i32
    return %arg0, %c0_i32 : i32, i32
  }
  func.func @transform_1(%arg0: i32) -> (i32, i32) {
    %c0_i32 = arith.constant 0 : i32
    %c0_i32_0 = arith.constant 0 : i32
    %c0_i32_1 = arith.constant 0 : i32
    return %c0_i32, %c0_i32_0 : i32, i32
  }
  func.func @transform_2(%arg0: i32) -> (i32, i32) {
    %c0_i32 = arith.constant 0 : i32
    %c0_i32_0 = arith.constant 0 : i32
    return %arg0, %c0_i32 : i32, i32
  }
}

</mosaic_0001>

<bundles_post_ra>
// kernel: tpu_custom_call.1
= control target key start
LH: loop header
LB: loop body
LE: loop exit
PB: predicated region body
PF: predicated region fallthrough
CT: control target
= control target key end

     0   :  { %7 = vsyncpa [#allocation3], 0  ;;  %s273_s0 = inlined_call_operand.hbm [shape: f32[16,11], index: 0, kind: input, shape index: {}]   ;;  %s274_s1 = inlined_call_operand.hbm [shape: f32[11,128], index: 1, kind: input, shape index: {}]   ;;  %s275_s2 = inlined_call_operand.hbm [shape: f32[16,128], index: 2, kind: output, shape index: {}]  }
   0x1   :  { %8 = vsyncpa [#allocation6], 0 }
   0x2   :  { %9 = vsyncpa [#allocation4], 0  ;;  %s235_s9 = smov [#allocation2]  }
   0x3   :  { %s15_s10 = sshll.u32 %s235_s9, 4  ;;  %s16_s10 = int_to_ptr.vmem [resolvable:$true] %s15_s10 }
   0x4   :  { %s177_s11 = scalar_lea.vmem %s16_s10, 256  ;;  %p182_p1 = scmp.lt.s32.totalorder %s16_s10, %s16_s10 }
   0x5   :  { %p178_p0 = scmp.ne.s32.totalorder %s16_s10, %s177_s11  ;;  %p183_p2 = scmp.lt.s32.totalorder %s177_s11, %s177_s11 }
   0x7   :  { %p184_p3 = por %p183_p2, %p182_p1 }
   0x9   :  { %p185_p4 = pnand %p184_p3, %p178_p0 }
   0xb   :  { %188 = shalt.err (!%p185_p4)
}
   0xc   :  { %s236_s12 = smov 128   ;;  %s237_s13 = smov 8  }
   0xd   :  { %21 = dma.hbm_to_vmem [thread:$0]  %s273_s0, 256, %s16_s10, [#allocation3], %s236_s12, %s236_s12, %s237_s13  }
   0xe   :  { %s238_s16 = smov [#allocation5]  }
   0xf   :  { %s27_s17 = sshll.u32 %s238_s16, 4  ;;  %s28_s17 = int_to_ptr.vmem [resolvable:$true] %s27_s17 }
  0x10   :  { %s197_s18 = scalar_lea.vmem %s28_s17, 256  ;;  %p202_p6 = scmp.lt.s32.totalorder %s28_s17, %s28_s17 }
  0x11   :  { %p198_p5 = scmp.ne.s32.totalorder %s28_s17, %s197_s18  ;;  %p203_p7 = scmp.lt.s32.totalorder %s197_s18, %s197_s18 }
  0x13   :  { %p204_p8 = por %p203_p7, %p202_p6 }
  0x15   :  { %p205_p9 = pnand %p204_p8, %p198_p5 }
  0x17   :  { %208 = shalt.err (!%p205_p9)
}
  0x18   :  { %33 = dma.hbm_to_vmem [thread:$0]  %s274_s1, 256, %s28_s17, [#allocation6], %s236_s12, %s236_s12, %s237_s13  }
  0x19   :  { %229 = dma.done.wait [#allocation3], 256  }
  0x1a   :  { %230 = vsyncadd [#allocation3], 4294967040 }
  0x1b   :  { %231 = dma.done.wait [#allocation6], 256  }
  0x1c   :  { %232 = vsyncadd [#allocation6], 4294967040  ;;  %vm51_vm0 = vcmask 1042432   ;;  %vm44_vm1 = vcmask 89088   ;;  %v43_v0 = vld [vmem:[#allocation5 + $0x8] sm:$0x7] }
  0x1d   :  { %v42_v1 = vld [vmem:[#allocation5] sm:$0xff]  ;;  %v40_v2 = vld [vmem:[#allocation2] sm:$0xff]  ;;  %157 = vmatprep.subr.msk.mxu0 %vm51_vm0, %v43_v0  ;;  %v41_v3 = vld [vmem:[#allocation2 + $0x8] sm:$0xff]  ;;  %s239_s0 = smov [#allocation7]  }
  0x1e   :  { %161 = vmatprep.mubr.msk.f32.mxu0 %vm44_vm1, %v40_v2  ;;  %158 = vmatpush3.msk.msra.mxu0 %vm51_vm0, %v43_v0  ;;  %s137_s21 = sshll.u32 %s239_s0, 4  ;;  %s138_s21 = int_to_ptr.vmem [resolvable:$true] %s137_s21 }
  0x1f   :  { %159 = vmatprep.subr.mxu0 %v42_v1  ;;  %s209_s1 = scalar_lea.vmem %s138_s21, 256  ;;  %p214_p11 = scmp.lt.s32.totalorder %s138_s21, %s138_s21 }
  0x20   :  { %160 = vmatpush3.msra.mxu0 %v42_v1  ;;  %p210_p10 = scmp.ne.s32.totalorder %s138_s21, %s209_s1  ;;  %p215_p12 = scmp.lt.s32.totalorder %s209_s1, %s209_s1 }
  0x21   :  { %162 = vmatmul.mubr.msk.f32.vlgmr.msra.gmra.mxu0 %vm44_vm1, %v41_v3 }
  0x22   :  { %p216_p13 = por %p215_p12, %p214_p11 }
  0x24   :  { %p217_p0 = pnand %p216_p13, %p210_p10 }
  0xe1   :  { %v163_v4 = vpop.f32.mrf.mxu0 }
  0xe2   :  { %131 = vst [vmem:[#allocation7 + $0x8] sm:$0xff] %v163_v4 }
  0xe3   :  { %v121_v5 = vpop.f32.mrf.mxu0 }
  0xe4   :  { %130 = vst [vmem:[#allocation7] sm:$0xff] %v121_v5 }
  0xe5   :  { %220 = shalt.err (!%p217_p0)
}
  0xe6   :  { %143 = dma.vmem_to_hbm [thread:$0]  %s138_s21, 256, %s275_s2, [#allocation4], %s236_s12, %s236_s12, %s237_s13  }
  0xe7   :  { %233 = dma.done.wait [#allocation4], 256  }
  0xe8   :  { %234 = vsyncadd [#allocation4], 4294967040 }
  0xe9   :  { %147 = vsyncpa [#allocation3], 1 }
  0xea   :  { %148 = vsyncpa [#allocation6], 1 }
  0xeb   :  { %149 = vsyncpa [#allocation4], 1 }

</bundles_post_ra>
